<compile_context>
chip_gen: v7x
topology: tpu7x:2x2x1
jax: 0.10.0
libtpu: 0.0.40
codegen_flags: <defaults>
</compile_context>

<pallas_src>
import jax
import jax.numpy as jnp
from jax.experimental import pallas as pl
from jax.experimental.pallas import tpu as pltpu


# ----------------------------- setup (plain JAX glue) -----------------------------

def _round_up(x, m):
    return (x + m - 1) // m * m


def compute_partial_repr(input_points, control_points):
    # input_points: (N, 2), control_points: (M, 2) -> (N, M)
    # Matches PyTorch spec: dist_sq * log(dist_sq + 1e-6)
    diff = input_points[:, None, :] - control_points[None, :, :]
    dist_sq = jnp.sum(diff * diff, axis=-1)
    return dist_sq * jnp.log(dist_sq + 1e-6)


def _choose_hw_tiling(HW, max_tile=8192, min_tiles=2):
    """Lane tiling of the HW axis.

    Returns (hw_tile, n_tiles, hw_pad) with hw_tile a multiple of 128,
    hw_pad = hw_tile * n_tiles >= HW, and n_tiles >= min_tiles whenever HW allows it
    (so the "parallel" grid axis shards across both v7x TensorCores). max_tile=8192
    keeps per-tile VMEM (A_T bf16 tile + f32 out tile, double-buffered) well under
    the scoped VMEM defaults on every generation.
    """
    hw128 = _round_up(HW, 128)
    if hw128 <= 128:
        tile = hw128
    elif hw128 <= min_tiles * max_tile:
        tile = _round_up(pl.cdiv(hw128, min_tiles), 128)
    else:
        tile = max_tile
    n_tiles = pl.cdiv(hw128, tile)
    return tile, n_tiles, tile * n_tiles


def build_tps_buffers(target_height, target_width, target_control_points):
    """Replicates TPSGridGen.__init__ buffer construction.

    Returns (inverse_kernel, target_coordinate_repr, A_T) where
        A_T = (target_coordinate_repr @ inverse_kernel).T     # (N+3, HW_pad)
    is the only buffer the Pallas forward pass needs. It is zero-padded along HW to
    the tiling chosen by _choose_hw_tiling and cast ONCE to bfloat16 (halves the
    dominant HBM stream of the memory-bound forward GEMM).
    """
    tcp = target_control_points.astype(jnp.float32)
    N = tcp.shape[0]

    repr_cc = compute_partial_repr(tcp, tcp)
    fk = jnp.zeros((N + 3, N + 3), jnp.float32)
    fk = fk.at[:N, :N].set(repr_cc)
    fk = fk.at[:N, N].set(1.0)
    fk = fk.at[N, :N].set(1.0)
    fk = fk.at[:N, N + 1:N + 3].set(tcp)
    fk = fk.at[N + 1:N + 3, :N].set(tcp.T)
    inverse_kernel = jnp.linalg.inv(fk).astype(jnp.float32)

    HW = target_height * target_width
    ys = jnp.linspace(-1.0, 1.0, target_height)
    xs = jnp.linspace(-1.0, 1.0, target_width)
    target_coordinate = jnp.stack(
        jnp.meshgrid(ys, xs, indexing="ij"), axis=2).reshape(-1, 2).astype(jnp.float32)
    repr_tc = compute_partial_repr(target_coordinate, tcp)
    target_coordinate_repr = jnp.concatenate(
        [repr_tc, jnp.ones((HW, 1), jnp.float32), target_coordinate],
        axis=1).astype(jnp.float32)

    # Fold inverse_kernel into the repr buffer at init time, pre-transpose so HW sits
    # on the lane dimension, pad HW to the tiling, and cast once to bf16.
    A = target_coordinate_repr @ inverse_kernel            # (HW, N+3) f32
    _, _, hw_pad = _choose_hw_tiling(HW)
    A_T = jnp.pad(A.T, ((0, 0), (0, hw_pad - HW)))          # (N+3, hw_pad)
    A_T = A_T.astype(jnp.bfloat16)

    return inverse_kernel, target_coordinate_repr, A_T


# --------------------------------- Pallas kernel ----------------------------------

def tps_grid_kernel(yT_ref, aT_ref, out_ref):
    # yT_ref : (2B_pad, N+3)      f32  -- stacked batch LHS (zero-padded), resident
    # aT_ref : (N+3, hw_tile)     bf16 -- folded+transposed TPS basis tile (lane-dense)
    # out_ref: (2B_pad, hw_tile)  f32  -- lane-dense output slab
    out_ref[...] = jnp.dot(yT_ref[...], aT_ref[...].astype(jnp.float32),
                           preferred_element_type=jnp.float32)


def tps_grid_gen(source_control_points, A_T, HW, *, lane_dense_output=False):
    """Forward pass of TPSGridGen.

    Default returns (HW, B, 2) like PyTorch's `source_coordinate.permute(1, 0, 2)`.
    With lane_dense_output=True returns the lane-dense (B, 2, HW) slab instead, so a
    downstream consumer can avoid the extra HBM round-trip of the transpose.
    """
    B, N, two = source_control_points.shape
    assert two == 2
    Np3, hw_pad = A_T.shape
    assert Np3 == N + 3
    twoB = 2 * B
    rows = _round_up(twoB, 8)                               # sublane-aligned LHS/output

    hw_tile, n_tiles, hw_pad_expected = _choose_hw_tiling(HW)
    assert hw_pad == hw_pad_expected, (hw_pad, hw_pad_expected)

    # Stacked LHS Y_T (rows, N+3): rows are [b0_x, b0_y, b1_x, b1_y, ...], 3 zero
    # columns appended (== cat([scp, zeros(B,3,2)], dim=1)), zero rows up to `rows`.
    Y_T = jnp.transpose(source_control_points.astype(jnp.float32), (0, 2, 1))
    Y_T = Y_T.reshape(twoB, N)
    Y_T = jnp.pad(Y_T, ((0, rows - twoB), (0, 3)))           # (rows, N+3)

    cost = pl.CostEstimate(
        flops=2 * rows * Np3 * hw_pad,
        transcendentals=0,
        bytes_accessed=(A_T.size * A_T.dtype.itemsize        # dominant bf16 stream
                        + Y_T.size * 4
                        + rows * hw_pad * 4),
    )

    out = pl.pallas_call(
        tps_grid_kernel,
        out_shape=jax.ShapeDtypeStruct((rows, hw_pad), jnp.float32),
        grid_spec=pltpu.PrefetchScalarGridSpec(
            num_scalar_prefetch=0,
            grid=(n_tiles,),
            in_specs=[
                pl.BlockSpec((rows, Np3), lambda t: (0, 0)),      # Y_T (resident)
                pl.BlockSpec((Np3, hw_tile), lambda t: (0, t)),   # A_T tile (lane-dense)
            ],
            out_specs=pl.BlockSpec((rows, hw_tile), lambda t: (0, t)),
        ),
        compiler_params=pltpu.CompilerParams(
            dimension_semantics=("parallel",)),
        cost_estimate=cost,
    )(Y_T, A_T)                                              # (rows, hw_pad)

    out = out[:twoB, :HW].reshape(B, 2, HW)
    if lane_dense_output:
        return out                                           # (B, 2, HW) lane-dense
    # (B, 2, HW) -> (HW, B, 2)   (PyTorch: permute(1, 0, 2))
    return jnp.transpose(out, (2, 0, 1))


# ------------------------------------- main ---------------------------------------

if __name__ == "__main__":
    target_height, target_width = 16, 16
    grid_size = 4                                    # 4x4 = 16 control points
    HW = target_height * target_width

    # Deterministic target control points: regular grid in [-1, 1]^2.
    r = jnp.linspace(-1.0, 1.0, grid_size)
    target_control_points = jnp.stack(
        jnp.meshgrid(r, r, indexing="ij"), axis=2).reshape(-1, 2).astype(jnp.float32)

    inverse_kernel, target_coordinate_repr, A_T = build_tps_buffers(
        target_height, target_width, target_control_points)

    batch = 2
    N = target_control_points.shape[0]
    key = jax.random.PRNGKey(0)
    noise = 0.05 * jax.random.normal(key, (batch, N, 2), jnp.float32)
    source_control_points = target_control_points[None, :, :] + noise   # (B, N, 2)

    out = tps_grid_gen(source_control_points, A_T, HW)
    out = jax.block_until_ready(out)
    assert out.shape == (HW, batch, 2), out.shape

    # (a) Tight check: reference using the SAME bf16-quantized A_T (validates the
    #     Pallas GEMM itself, independent of bf16 quantization error).
    Y_T = jnp.transpose(source_control_points, (0, 2, 1)).reshape(2 * batch, N)
    Y_T = jnp.pad(Y_T, ((0, 0), (0, 3))).astype(jnp.float32)
    ref_q = Y_T @ A_T[:, :HW].astype(jnp.float32)            # (2B, HW)
    ref_q = jnp.transpose(ref_q.reshape(batch, 2, HW), (2, 0, 1))
    assert jnp.allclose(out, ref_q, atol=5e-5, rtol=1e-5), float(jnp.max(jnp.abs(out - ref_q)))

    # (b) Loose check vs the full-precision (unfolded) PyTorch formulation; the gap is
    #     bounded by bf16 quantization of A_T (coordinates are O(1)).
    Y_ref = jnp.concatenate(
        [source_control_points, jnp.zeros((batch, 3, 2), jnp.float32)], axis=1)
    mapping_ref = jnp.einsum("ij,bjk->bik", inverse_kernel, Y_ref)
    ref = jnp.einsum("hj,bjk->hbk", target_coordinate_repr, mapping_ref)
    err = float(jnp.max(jnp.abs(out - ref)))
    assert err < 8e-2, err

    print("KERNEL_OK")
</pallas_src>

<mosaic_0001>
module attributes {stable_mosaic.version = 11 : i64} {
  func.func @tps_grid_kernel(%arg0: i32, %arg1: memref<8x19xf32, #tpu.memory_space<vmem>>, %arg2: memref<19x128xbf16, #tpu.memory_space<vmem>>, %arg3: memref<8x128xf32, #tpu.memory_space<vmem>>) attributes {dimension_semantics = [#tpu.dimension_semantics<parallel>], iteration_bounds = array<i64: 2>, scalar_prefetch = 0 : i64, scratch_operands = 0 : i64, tpu.core_type = #tpu.core_type<tc>, window_params = [{pipeline_mode = #tpu.pipeline_mode<synchronous>, transform_indices = @transform_0, window_bounds = array<i64: 8, 19>}, {transform_indices = @transform_1, window_bounds = array<i64: 19, 128>}, {transform_indices = @transform_2, window_bounds = array<i64: 8, 128>}]} {
    %c0 = arith.constant 0 : index
    %c0_0 = arith.constant 0 : index
    %0 = vector.load %arg1[%c0, %c0_0] : memref<8x19xf32, #tpu.memory_space<vmem>>, vector<8x19xf32>
    %c0_1 = arith.constant 0 : index
    %c0_2 = arith.constant 0 : index
    %1 = vector.load %arg2[%c0_1, %c0_2] : memref<19x128xbf16, #tpu.memory_space<vmem>>, vector<19x128xbf16>
    %2 = arith.extf %1 : vector<19x128xbf16> to vector<19x128xf32>
    %cst = arith.constant dense<0.000000e+00> : vector<8x128xf32>
    %3 = tpu.matmul %0, %2, %cst {dimension_numbers = #tpu.dot_dimension_numbers<[1], [0], [0], [1], [0, 0, 1, 1], [], []>} : vector<8x19xf32>, vector<19x128xf32>, vector<8x128xf32> -> vector<8x128xf32>
    %c0_3 = arith.constant 0 : index
    %c0_4 = arith.constant 0 : index
    %4 = vector.load %arg3[%c0_3, %c0_4] : memref<8x128xf32, #tpu.memory_space<vmem>>, vector<8x128xf32>
    tpu.vector_store %arg3[%c0_3, %c0_4], %3 {strides = array<i32>} : memref<8x128xf32, #tpu.memory_space<vmem>>, vector<8x128xf32>,
    return
  }
  func.func @transform_0(%arg0: i32) -> (i32, i32) {
    %c0_i32 = arith.constant 0 : i32
    %c0_i32_0 = arith.constant 0 : i32
    %c0_i32_1 = arith.constant 0 : i32
    return %c0_i32, %c0_i32_0 : i32, i32
  }
  func.func @transform_1(%arg0: i32) -> (i32, i32) {
    %c0_i32 = arith.constant 0 : i32
    %c0_i32_0 = arith.constant 0 : i32
    return %c0_i32, %arg0 : i32, i32
  }
  func.func @transform_2(%arg0: i32) -> (i32, i32) {
    %c0_i32 = arith.constant 0 : i32
    %c0_i32_0 = arith.constant 0 : i32
    return %c0_i32, %arg0 : i32, i32
  }
}

</mosaic_0001>

<bundles_post_ra>
// kernel: tpu_custom_call.1
= control target key start
LH: loop header
LB: loop body
LE: loop exit
PB: predicated region body
PF: predicated region fallthrough
CT: control target
= control target key end

     0   :  { %7 = vsyncpa [#allocation3], 0  ;;  %s806_s0 = inlined_call_operand.hbm [shape: f32[8,19], index: 0, kind: input, shape index: {}]   ;;  %s807_s1 = inlined_call_operand.hbm [shape: bf16[19,256], index: 1, kind: input, shape index: {}]   ;;  %s808_s2 = inlined_call_operand.hbm [shape: f32[8,256], index: 2, kind: output, shape index: {}]  }
   0x1   :  { %8 = vsyncpa [#allocation6], 0 }
   0x2   :  { %10 = vsyncpa [#allocation6 + $0x1], 0 }
   0x3   :  { %11 = vsyncpa [#allocation4], 0 }
   0x4   :  { %13 = vsyncpa [#allocation4 + $0x1], 0  ;;  %s609_s9 = smov 0   ;;  %s611_s10 = smov 0  }
   0x5   :  { %s613_s11 = smov 0   ;;  %s615_s12 = smov 0  }
   0x6 LB: > { %s630_s13 = sadd.s32 4294967295, %s583_s12   ;;  %s356_s14 = sadd.s32 4294967294, %s583_s12   ;;  %s583_s12 = sphi %s615_s12, %s833_s12   ;;  %s579_s11 = sphi %s613_s11, %s832_s11   ;;  %s575_s10 = sphi %s611_s10, %s831_s10   ;;  %s571_s9 = sphi %s609_s9, %s830_s9  }
   0x7   : > { %s634_s15 = sadd.s32 1, %s583_s12   ;;  %s47_s16 = sadd.s32 1, %s579_s11 }
   0x8   : > { %s44_s17 = ssub.s32 %s583_s12, %s634_s15  ;;  %p54_p0 = scmp.ne.s32.totalorder %s579_s11, %s575_s10 }
   0x9   : > { %p45_p1 = scmp.eq.s32.totalorder %s44_s17, 0  ;;  %p55_p2 = scmp.eq.s32.totalorder %s583_s12, 0 }
   0xa   : > { %p60_p3 = scmp.ne.s32.totalorder %s575_s10, %s571_s9  ;;  %p809_p4 = scmp.eq.s32.totalorder %s630_s13, 0 }
   0xb   : > { %s646_s18 = scalar_select %p45_p1, %s579_s11, %s47_s16  }
   0xc   : > { %p648_p5 = por %p55_p2, %p54_p0  ;;  %p654_p6 = por %p809_p4, %p60_p3 }
   0xd   : > { %p84_p7 = scmp.eq.s32.totalorder %s630_s13, 1  ;;  %p90_p8 = scmp.eq.s32.totalorder %s356_s14, 1 }
   0xe   : > { %s815_s20 = scalar_select %p654_p6, 1, 0 }
   0xf   : > { %p357_p9 = scmp.ge.s32.totalorder %s583_s12, 1  ;;  %p97_p10 = scmp.lt.s32.totalorder %s583_s12, 3 }
  0x10   : > { %p661_p11 = por %p84_p7, %p54_p0  ;;  %p665_p12 = por %p90_p8, %p60_p3 }
  0x11   : > { %p669_p13 = pnand %p357_p9, %p97_p10  ;;  %s585_s24 = smov [#allocation2]  }
  0x12   : > { %s816_s21 = scalar_select %p661_p11, 1, 0 }
  0x13   : > { %s817_s22 = scalar_select %p665_p12, 1, 0 }
  0x14   : > { %s818_s23 = scalar_select %p669_p13, 1, 0 }
  0x15   : > { %p400_p2 = pneg %p669_p13  ;;  %s110_s25 = sshll.u32 %s585_s24, 4  ;;  %s111_s25 = int_to_ptr.vmem [resolvable:$true] %s110_s25 }
  0x16   : > { %p413_p4 = scmp.lt.s32.totalorder %s583_s12, 2  ;;  %p819_p0 = scmp.eq.s32.totalorder %s630_s13, 0 }
  0x17   : > { %s121_s27 = sand.u32 1, %s579_s11   ;;  %s455_s4 = scalar_lea.hbm %s806_s0, 128 }
  0x18   : > { %p679_p7 = pnand %p400_p2, %p819_p0  ;;  %p686_p3 = pnand %p413_p4, %p648_p5 }
  0x19   : > { %s390_s29 = smul.u32 12, %s121_s27  ;;  %p456_p8 = scmp.ne.s32.totalorder %s806_s0, %s455_s4 }
  0x1a   : > { %s821_s28 = scalar_select %p686_p3, 1, 0 }
  0x1b   : > { %p457_p9 = pneg %p679_p7  ;;  %p462_p4 = scmp.lt.u32.totalorder %s455_s4, %s806_s0 }
  0x1d   : > { %p458_p10 = pnand %p457_p9, %p456_p8 }
  0x1f   : > { %p459_p2 = pneg %p458_p10 }
  0x21   : > { %p464_p5 = pnand %p462_p4, %p459_p2 }
  0x23   : > { %467 = shalt.err (!%p464_p5)
}
  0x24   : > { %s468_s14 = scalar_lea.vmem %s111_s25, 128  ;;  %p476_p11 = scmp.lt.s32.totalorder %s111_s25, %s111_s25 }
  0x25   : > { %p469_p0 = scmp.ne.s32.totalorder %s111_s25, %s468_s14  ;;  %p477_p6 = scmp.lt.s32.totalorder %s468_s14, %s468_s14 }
  0x27   : > { %p471_p1 = pnand %p469_p0, %p457_p9  ;;  %p478_p13 = por %p477_p6, %p476_p11 }
  0x29   : > { %p472_p12 = pneg %p471_p1 }
  0x2b   : > { %p479_p3 = pnand %p478_p13, %p472_p12 }
  0x2d   : > { %482 = shalt.err (!%p479_p3)
}
  0x2e   : > { %403 = dma.hbm_to_vmem [thread:$0]  (!%p679_p7), %s806_s0, 128, %s111_s25, [#allocation3]  }
  0x2f   : > { %s360_s19 = sshll.u32 %s583_s12, 6  ;;  %s125_s24 = scalar_lea.vmem [#allocation5], %s390_s29 }
  0x30   : > { %s131_s30 = sshll.u32 %s125_s24, 4  ;;  %s710_s5 = scalar_lea.hbm %s807_s1, %s360_s19  ;;  %s712_s30 = int_to_ptr.vmem [resolvable:$true] %s131_s30 }
  0x31   : > { %s714_s26 = scalar_lea.sflag [#allocation6], %s121_s27  ;;  %s483_s6 = scalar_lea.hbm %s710_s5, 192 }
  0x32   : > { %p484_p6 = scmp.ne.s32.totalorder %s710_s5, %s483_s6  ;;  %p822_p11 = scmp.ne.s32.totalorder %s821_s28, 0 }
  0x33   : > { %s488_s7 = scalar_lea.hbm %s807_s1, 384  ;;  %p489_p7 = scmp.lt.u32.totalorder %s710_s5, %s807_s1 }
  0x34   : > { %p485_p12 = pneg %p822_p11  ;;  %p490_p3 = scmp.lt.u32.totalorder %s488_s7, %s483_s6 }
  0x35   : > { %p492_p9 = scmp.lt.u32.totalorder %s483_s6, %s710_s5 }
  0x36   : > { %p486_p13 = pnand %p485_p12, %p484_p6  ;;  %p491_p8 = por %p490_p3, %p489_p7 }
  0x38   : > { %p487_p1 = pneg %p486_p13  ;;  %p493_p10 = por %p492_p9, %p491_p8 }
  0x3a   : > { %p494_p2 = pnand %p493_p10, %p487_p1 }
  0x3c   : > { %497 = shalt.err (!%p494_p2)
}
  0x3d   : > { %s498_s27 = scalar_lea.vmem %s712_s30, 192  ;;  %s586_s16 = smov [#allocation5]  }
  0x3e   : > { %p499_p4 = scmp.ne.s32.totalorder %s712_s30, %s498_s27  ;;  %s503_s17 = sshll.u32 %s586_s16, 4  ;;  %s504_s17 = int_to_ptr.vmem [resolvable:$false] %s503_s17 }
  0x3f   : > { %s505_s19 = scalar_lea.vmem %s504_s17, 384  ;;  %p506_p6 = scmp.lt.s32.totalorder %s712_s30, %s504_s17 }
  0x40   : > { %p501_p5 = pnand %p499_p4, %p485_p12  ;;  %p507_p13 = scmp.lt.s32.totalorder %s505_s19, %s498_s27 }
  0x42   : > { %p502_p0 = pneg %p501_p5  ;;  %p508_p7 = por %p507_p13, %p506_p6 }
  0x44   : > { %p509_p3 = pnand %p508_p7, %p502_p0 }
  0x46   : > { %512 = shalt.err (!%p509_p3)
}
  0x47   : > { %s587_s24 = smov 128   ;;  %s588_s3 = smov 64  }
  0x48   : > { %s589_s4 = smov 4   ;;  %p823_p12 = scmp.ne.s32.totalorder %s818_s23, 0 }
  0x49   : > { %407 = dma.hbm_to_vmem [thread:$0]  (!%p822_p11), %s710_s5, 192, %s712_s30, %s714_s26, %s587_s24, %s588_s3, %s589_s4  }
  0x4a   : > { %143 = sbr.rel (%p823_p12) target bundleno = 320 (0x140), region = 28  ;;  %p824_p1 = scmp.eq.s32.totalorder (!%p823_p12), %s630_s13, 0 }
  0x51   : > { %558 = dma.done.wait (%p824_p1), [#allocation3], 128   ;;  %p825_p8 = pmov %p824_p1 }
  0x52   : > { %s749_s6 = sand.u32 1, %s575_s10   ;;  %p826_p9 = scmp.ne.s32.totalorder %s815_s20, 0 }
  0x53   : > { %560 = vsyncadd (%p825_p8), [#allocation3], 4294967168  ;;  %s391_s25 = smul.u32 12, %s749_s6  ;;  %s150_s29 = scalar_lea.sflag [#allocation6], %s749_s6 }
  0x55   : > { %s153_s7 = scalar_lea.vmem [#allocation5], %s391_s25 }
  0x56   : > { %562 = dma.done.wait (%p826_p9), %s150_s29, 192  }
  0x57   : > { %564 = vsyncadd (%p826_p9), %s150_s29, 4294967104  ;;  %v590_v0 = vmov 0.0|0.0   ;;  %vm591_vm0 = vmmov 0   ;;  %v592_v1 = vmov 0.0   ;;  %v371_v2 = vld [vmem:[%s153_s7] sm:$0xff]   ;;  %vm185_vm1 = vcmask 1042432  }
  0x58   : > { %387 = vmatprep.subr.bf16.mxu0 %v590_v0  ;;  %384 = vmatprep.mubr.msk.f32.mxu0 %vm591_vm0, %v592_v1  ;;  %v177_v3 = vld [vmem:[%s153_s7 + $0x8] sm:$0x3]  ;;  %v174_v5 = vld [vmem:[#allocation2] sm:$0xff]  ;;  %vm181_vm2 = vcmask 154624   ;;  %s363_s20 = sshll.u32 %s749_s6, 3  ;;  %s367_s30 = sshll.u32 %s630_s13, 7 }
  0x59   : > { %389 = vmatpush3.bf16.msra.mxu0 %v371_v2  ;;  %v180_v4 = vunpack.c.l.bf16 %v177_v3  ;;  %s173_s23 = scalar_lea.vmem [#allocation7], %s363_s20  ;;  %s764_s8 = scalar_lea.hbm %s808_s2, %s367_s30 }
  0x5a   : > { %382 = vmatprep.subr.mxu0 %v592_v1  ;;  %s274_s28 = sshll.u32 %s173_s23, 4  ;;  %s261_s14 = scalar_lea.sflag [#allocation4], %s749_s6  ;;  %s759_s28 = int_to_ptr.vmem [resolvable:$true] %s274_s28 }
  0x5b   : > { %s513_s27 = scalar_lea.vmem %s759_s28, 128  ;;  %p827_p10 = scmp.ne.s32.totalorder %s816_s21, 0 }
  0x5c   : > { %p514_p11 = scmp.ne.s32.totalorder %s759_s28, %s513_s27  ;;  %s593_s13 = smov [#allocation7]  }
  0x5d   : > { %383 = vmatpush3.msk.msra.mxu0 %vm185_vm1, %v180_v4  ;;  %s517_s16 = sshll.u32 %s593_s13, 4  ;;  %s518_s16 = int_to_ptr.vmem [resolvable:$false] %s517_s16 }
  0x5e   : > { %385 = vmatmul.mubr.msk.f32.vlgmr.msra.gmra.mrb[0].mxu0 %vm181_vm2, %v174_v5  ;;  %p515_p2 = pnand %p514_p11, %p827_p10  ;;  %s519_s17 = scalar_lea.vmem %s518_s16, 256 }
  0x5f   : > { %p520_p5 = scmp.lt.s32.totalorder %s759_s28, %s518_s16  ;;  %p521_p0 = scmp.lt.s32.totalorder %s519_s17, %s513_s27 }
  0x60   : > { %p516_p4 = pneg %p515_p2 }
  0x61   : > { %p522_p6 = por %p521_p0, %p520_p5 }
  0x63   : > { %p523_p13 = pnand %p522_p6, %p516_p4 }
 0x131   : > { %v255_v6 = vpop.f32.mrb[0].mxu0 }
 0x132   : > { %259 = vst [vmem:[%s173_s23] sm:$0xff] %v255_v6  ;;  %v386_v7 = vpop.f32.mrb[1].mxu0 }
 0x133   : > { %526 = shalt.err (!%p523_p13)
}
 0x134   : > { %s527_s19 = scalar_lea.hbm %s764_s8, 128  ;;  %s531_s4 = scalar_lea.hbm %s808_s2, 256 }
 0x135   : > { %p528_p7 = scmp.ne.s32.totalorder %s764_s8, %s527_s19  ;;  %p532_p1 = scmp.lt.u32.totalorder %s764_s8, %s808_s2 }
 0x136   : > { %p533_p8 = scmp.lt.u32.totalorder %s531_s4, %s527_s19  ;;  %p535_p11 = scmp.lt.u32.totalorder %s527_s19, %s764_s8 }
 0x137   : > { %p529_p3 = pnand %p528_p7, %p827_p10 }
 0x138   : > { %p534_p9 = por %p533_p8, %p532_p1 }
 0x139   : > { %p530_p12 = pneg %p529_p3 }
 0x13a   : > { %p536_p2 = por %p535_p11, %p534_p9 }
 0x13c   : > { %p537_p4 = pnand %p536_p2, %p530_p12 }
 0x13e   : > { %540 = shalt.err (!%p537_p4)
}
 0x13f   : > { %398 = dma.vmem_to_hbm [thread:$0]  (%p827_p10), %s759_s28, 128, %s764_s8, %s261_s14  }
 0x140 PF: > { %s286_s29 = sand.u32 1, %s571_s9   ;;  %p828_p5 = scmp.ne.s32.totalorder %s817_s22, 0 }
 0x141   : > { %p829_p0 = scmp.ge.s32.totalorder %s583_s12, 2  ;;  %s287_s7 = scalar_lea.sflag [#allocation4], %s286_s29 }
 0x143   : > { %p409_p6 = pnand %p829_p0, %p828_p5 }
 0x145   : > { %566 = dma.done.wait (!%p409_p6), %s287_s7, 128  }
 0x146   : > { %568 = vsyncadd (!%p409_p6), %s287_s7, 4294967168  ;;  %p16_p13 = scmp.ge.s32.totalorder %s634_s15, 4   ;;  %s830_s9 = smov %s575_s10 }
 0x147   : > { %s831_s10 = smov %s579_s11  ;;  %s832_s11 = smov %s646_s18 }
 0x148   : > { %s833_s12 = smov %s634_s15  ;;  %18 = sbr.rel (!%p16_p13) target bundleno = 6 (0x6), region = 78 }
 0x14f   :  { %292 = vsyncpa [#allocation3], 1 }
 0x150   :  { %294 = vsyncpa [#allocation3 + $0x1], 1 }
 0x151   :  { %295 = vsyncpa [#allocation6], 1 }
 0x152   :  { %297 = vsyncpa [#allocation6 + $0x1], 1 }
 0x153   :  { %298 = vsyncpa [#allocation4], 1 }
 0x154   :  { %300 = vsyncpa [#allocation4 + $0x1], 1 }

</bundles_post_ra>
